<compile_context>
chip_gen: v5e
topology: v5e:2x2
jax: 0.10.0
libtpu: 0.0.40
codegen_flags: <defaults>
</compile_context>

<pallas_src>
import jax
import jax.numpy as jnp
import numpy as np
from jax.experimental import pallas as pl
from jax.experimental.pallas import tpu as pltpu

HIDDEN = 32
INPUT_DIM = 1
NUM_LAYERS = 12
OUTPUT_DIM = 1


def lstm_stack_kernel(x_ref, wih0_ref, wih_ref, b_ref, fcw_ref, fcb_ref, out_ref):
    """Single-program kernel: 12 stacked single-step LSTM cells + final Linear.

    Packed gate column order is [o | i | f | g]; sigmoid-gate columns (o, i, f)
    of the weights/biases are pre-scaled by 0.5 at packing time.

    x_ref   : (B, 1)        raw input feature (INPUT_DIM == 1)
    wih0_ref: (1, 4H)       layer-0 W_ih^T (only INPUT_DIM rows exist)
    wih_ref : (L-1, H, 4H)  W_ih^T for layers 1..L-1
    b_ref   : (L, 4H)       b_ih + b_hh per layer
    fcw_ref : (H, OUT)      fc weight transposed
    fcb_ref : (1,) [SMEM]   fc bias scalar
    out_ref : (B, OUT)
    """
    B = x_ref.shape[0]
    H = HIDDEN
    G = 4 * H

    # Lane mask selecting the g-gate block [3H, 4H); hoisted out of the loop
    # (broadcast_in_dim is not CSE'd by JAX).  Single comparison.
    lane = jax.lax.broadcasted_iota(jnp.int32, (B, G), 1)
    is_g = lane >= 3 * H

    def cell(gates):
        # One full-width EUP tanh; sigmoid gates were pre-scaled by 0.5 at
        # packing time, so sigma(z) = 0.5*tanh(z/2) + 0.5 comes out of the same
        # pass.  Lane blocks of act: [0,H)=sig(o), [H,2H)=sig(i),
        # [2H,3H)=sig(f), [3H,4H)=tanh(g).
        t = jnp.tanh(gates)
        act = jnp.where(is_g, t, 0.5 * t + 0.5)
        # c_prev == 0 -> c = i * g.  i ([H,2H)) and g ([3H,4H)) are 2H apart,
        # so the symmetric 2H rotation lines them up; c lands in BOTH blocks
        # [H,2H) and [3H,4H) of `prod` (junk elsewhere, all bounded).
        prod = act * pltpu.roll(act, shift=2 * H, axis=1)
        tanh_c = jnp.tanh(prod)
        # tanh(c) sits in blocks [H,2H) and [3H,4H) (2H apart), so an H
        # rotation puts it under o ([0,H)) regardless of roll direction:
        # h = o * tanh(c) lands in the leading lane block -> zero-shift slice,
        # no cross-lane relayout before the next layer's matmul.
        h_full = act * pltpu.roll(tanh_c, shift=H, axis=1)
        return h_full[:, :H]                            # (B, H)

    # Layer 0: single non-zero input feature -> outer-product broadcast on the
    # VPU, no MXU matmul needed.
    gates = x_ref[...] * wih0_ref[...] + b_ref[0][None, :]
    h = cell(gates)

    # Layers 1..L-1: statically unrolled chain of dependent (B,H)x(H,4H)
    # matmuls; weight loads / RHS pushes are grid-invariant and can be hoisted
    # off the h-dependency chain by the scheduler.
    for l in range(1, NUM_LAYERS):
        gates = (
            jnp.dot(h, wih_ref[l - 1], preferred_element_type=jnp.float32)
            + b_ref[l][None, :]
        )
        h = cell(gates)

    # Final Linear.  OUT == 1 -> masked store; negligible for one tiny tile.
    out_ref[...] = (
        jnp.dot(h, fcw_ref[...], preferred_element_type=jnp.float32) + fcb_ref[0]
    )


def lstm_model_forward(x, packed_params):
    """x: (B, INPUT_DIM) float32 -> (B, OUTPUT_DIM) float32."""
    assert x.shape[1] == INPUT_DIM == 1
    wih0, wih_rest, bias, fcw, fcb = packed_params
    B = x.shape[0]
    # Pad batch to a full 8-sublane vreg so every in-kernel value is a single
    # aligned (8, 128) tile; junk rows are sliced off below.
    B_pad = max(8, ((B + 7) // 8) * 8)
    x_p = jnp.zeros((B_pad, INPUT_DIM), jnp.float32).at[:B].set(x)

    vmem = pl.BlockSpec(memory_space=pltpu.MemorySpace.VMEM)
    smem = pl.BlockSpec(memory_space=pltpu.MemorySpace.SMEM)
    out = pl.pallas_call(
        lstm_stack_kernel,
        out_shape=jax.ShapeDtypeStruct((B_pad, OUTPUT_DIM), jnp.float32),
        in_specs=[vmem, vmem, vmem, vmem, vmem, smem],
        out_specs=vmem,
        # Grid-less single program: at B=2 one tile is optimal (v5e/v6e have a
        # single TensorCore, so a grid would only add ~0.35 us/step of serial
        # overhead).  For large batches on v7x, add a leading batch grid axis
        # with batch-tiled x/out specs, constant-index weight specs and
        # dimension_semantics=("parallel",) so both TensorCores split the work.
    )(x_p, wih0, wih_rest, bias, fcw, fcb)
    return out[:B]


def init_params(key):
    """Raw parameters in PyTorch nn.LSTM / nn.Linear layout (gate order i,f,g,o).

    W_hh is kept only for the pure-JAX reference; it is mathematically dead for
    this forward (seq_len == 1, h0 == 0) and is never passed to the kernel.
    """
    k = 1.0 / np.sqrt(HIDDEN)
    keys = jax.random.split(key, 4 * NUM_LAYERS + 2)
    w_ih, w_hh, b_ih, b_hh = [], [], [], []
    for l in range(NUM_LAYERS):
        in_dim = INPUT_DIM if l == 0 else HIDDEN
        w_ih.append(jax.random.uniform(keys[4 * l + 0], (4 * HIDDEN, in_dim),
                                       jnp.float32, -k, k))
        w_hh.append(jax.random.uniform(keys[4 * l + 1], (4 * HIDDEN, HIDDEN),
                                       jnp.float32, -k, k))
        b_ih.append(jax.random.uniform(keys[4 * l + 2], (4 * HIDDEN,),
                                       jnp.float32, -k, k))
        b_hh.append(jax.random.uniform(keys[4 * l + 3], (4 * HIDDEN,),
                                       jnp.float32, -k, k))
    fc_w = jax.random.uniform(keys[-2], (OUTPUT_DIM, HIDDEN), jnp.float32, -k, k)
    fc_b = jax.random.uniform(keys[-1], (OUTPUT_DIM,), jnp.float32, -k, k)
    return dict(w_ih=w_ih, w_hh=w_hh, b_ih=b_ih, b_hh=b_hh,
                fc_w=fc_w, fc_b=fc_b)


def _pack_gate_cols(a):
    """(..., 4H) in PyTorch gate order [i|f|g|o] -> kernel order [o|i|f|g].

    Sigmoid-gate columns (o, i, f) are pre-scaled by 0.5 (exact in f32) so the
    kernel's single tanh pass yields sigma(z) = 0.5*tanh(z/2) + 0.5 for them.
    """
    H = HIDDEN
    i = a[..., 0 * H:1 * H]
    f = a[..., 1 * H:2 * H]
    g = a[..., 2 * H:3 * H]
    o = a[..., 3 * H:4 * H]
    return jnp.concatenate([0.5 * o, 0.5 * i, 0.5 * f, g], axis=-1)


def pack_params(raw):
    """Packing-time layout work: transpose, gate permutation, 0.5 pre-scale."""
    wih0 = _pack_gate_cols(raw["w_ih"][0].T)                        # (1, 4H)
    wih_rest = jnp.stack([_pack_gate_cols(raw["w_ih"][l].T)
                          for l in range(1, NUM_LAYERS)])           # (L-1, H, 4H)
    bias = jnp.stack([_pack_gate_cols(raw["b_ih"][l] + raw["b_hh"][l])
                      for l in range(NUM_LAYERS)])                  # (L, 4H)
    fcw = raw["fc_w"].T                                             # (H, OUT)
    fcb = raw["fc_b"]                                               # (OUT,) == (1,)
    return wih0, wih_rest, bias, fcw, fcb


def reference_forward(x, raw):
    """Pure-JAX reference with the full PyTorch LSTM equations (zero h0/c0,
    explicit W_hh term), guarding the algebraic simplifications in the kernel."""
    B = x.shape[0]
    H = HIDDEN
    inp = x                                                # (B, INPUT_DIM)
    for l in range(NUM_LAYERS):
        h_prev = jnp.zeros((B, H), jnp.float32)
        c_prev = jnp.zeros((B, H), jnp.float32)
        gates = (inp @ raw["w_ih"][l].T + h_prev @ raw["w_hh"][l].T
                 + raw["b_ih"][l][None, :] + raw["b_hh"][l][None, :])
        i_g = jax.nn.sigmoid(gates[:, 0 * H:1 * H])
        f_g = jax.nn.sigmoid(gates[:, 1 * H:2 * H])
        g_g = jnp.tanh(gates[:, 2 * H:3 * H])
        o_g = jax.nn.sigmoid(gates[:, 3 * H:4 * H])
        c = f_g * c_prev + i_g * g_g
        inp = o_g * jnp.tanh(c)
    return inp @ raw["fc_w"].T + raw["fc_b"][None, :]


if __name__ == "__main__":
    key = jax.random.PRNGKey(0)
    pkey, xkey = jax.random.split(key)
    raw_params = init_params(pkey)
    packed = pack_params(raw_params)

    batch = 2
    x = jax.random.normal(xkey, (batch, INPUT_DIM), jnp.float32)

    out = jax.block_until_ready(lstm_model_forward(x, packed))

    ref = reference_forward(x, raw_params)
    # Tolerance slightly looser than 1e-5: sigmoid is computed via the
    # tanh identity on the EUP instead of exp+reciprocal.
    np.testing.assert_allclose(np.asarray(out), np.asarray(ref),
                               rtol=1e-4, atol=1e-4)
    assert out.shape == (batch, OUTPUT_DIM)
    print("KERNEL_OK")
</pallas_src>

<mosaic_0001>
module attributes {stable_mosaic.version = 11 : i64} {
  func.func @lstm_stack_kernel(%arg0: memref<8x1xf32, #tpu.memory_space<vmem>>, %arg1: memref<1x128xf32, #tpu.memory_space<vmem>>, %arg2: memref<11x32x128xf32, #tpu.memory_space<vmem>>, %arg3: memref<12x128xf32, #tpu.memory_space<vmem>>, %arg4: memref<32x1xf32, #tpu.memory_space<vmem>>, %arg5: memref<1xf32, #tpu.memory_space<smem>>, %arg6: memref<8x1xf32, #tpu.memory_space<vmem>>) attributes {dimension_semantics = [], scalar_prefetch = 0 : i64, scratch_operands = 0 : i64, tpu.core_type = #tpu.core_type<tc>} {
    %0 = tpu.iota {dimensions = array<i32: 1>} : vector<8x128xi32>
    %c96_i32 = arith.constant 96 : i32
    %1 = vector.broadcast %c96_i32 : i32 to vector<8x128xi32>
    %2 = arith.cmpi sge, %0, %1 : vector<8x128xi32>
    %c0 = arith.constant 0 : index
    %c0_0 = arith.constant 0 : index
    %3 = vector.load %arg0[%c0, %c0_0] : memref<8x1xf32, #tpu.memory_space<vmem>>, vector<8x1xf32>
    %c0_1 = arith.constant 0 : index
    %c0_2 = arith.constant 0 : index
    %4 = vector.load %arg1[%c0_1, %c0_2] : memref<1x128xf32, #tpu.memory_space<vmem>>, vector<1x128xf32>
    %5 = vector.broadcast %3 : vector<8x1xf32> to vector<8x128xf32>
    %6 = vector.broadcast %4 : vector<1x128xf32> to vector<8x128xf32>
    %7 = arith.mulf %5, %6 : vector<8x128xf32>
    %c0_3 = arith.constant 0 : index
    %c0_4 = arith.constant 0 : index
    %8 = vector.load %arg3[%c0_3, %c0_4] : memref<12x128xf32, #tpu.memory_space<vmem>>, vector<1x128xf32>
    %9 = vector.shape_cast %8 : vector<1x128xf32> to vector<128xf32>
    %10 = vector.shape_cast %9 : vector<128xf32> to vector<1x128xf32>
    %11 = vector.broadcast %10 : vector<1x128xf32> to vector<8x128xf32>
    %12 = arith.addf %7, %11 : vector<8x128xf32>
    %13 = math.tanh %12 : vector<8x128xf32>
    %cst = arith.constant 5.000000e-01 : f32
    %14 = vector.broadcast %cst : f32 to vector<8x128xf32>
    %15 = arith.mulf %14, %13 : vector<8x128xf32>
    %cst_5 = arith.constant 5.000000e-01 : f32
    %16 = vector.broadcast %cst_5 : f32 to vector<8x128xf32>
    %17 = arith.addf %15, %16 : vector<8x128xf32>
    %18 = arith.select %2, %13, %17 : vector<8x128xi1>, vector<8x128xf32>
    %c64_i32 = arith.constant 64 : i32
    %19 = tpu.dynamic_rotate %18 by %c64_i32 dim 1 : vector<8x128xf32>, i32 -> vector<8x128xf32>
    %20 = arith.mulf %18, %19 : vector<8x128xf32>
    %21 = math.tanh %20 : vector<8x128xf32>
    %c32_i32 = arith.constant 32 : i32
    %22 = tpu.dynamic_rotate %21 by %c32_i32 dim 1 : vector<8x128xf32>, i32 -> vector<8x128xf32>
    %23 = arith.mulf %18, %22 : vector<8x128xf32>
    %24 = vector.extract_strided_slice %23 {offsets = [0, 0], sizes = [8, 32], strides = [1, 1]} : vector<8x128xf32> to vector<8x32xf32>
    %c0_6 = arith.constant 0 : index
    %c0_7 = arith.constant 0 : index
    %c0_8 = arith.constant 0 : index
    %25 = vector.load %arg2[%c0_6, %c0_7, %c0_8] : memref<11x32x128xf32, #tpu.memory_space<vmem>>, vector<1x32x128xf32>
    %26 = vector.shape_cast %25 : vector<1x32x128xf32> to vector<32x128xf32>
    %cst_9 = arith.constant dense<0.000000e+00> : vector<8x128xf32>
    %27 = tpu.matmul %24, %26, %cst_9 {dimension_numbers = #tpu.dot_dimension_numbers<[1], [0], [0], [1], [0, 0, 1, 1], [], []>} : vector<8x32xf32>, vector<32x128xf32>, vector<8x128xf32> -> vector<8x128xf32>
    %c1 = arith.constant 1 : index
    %c0_10 = arith.constant 0 : index
    %28 = vector.load %arg3[%c1, %c0_10] : memref<12x128xf32, #tpu.memory_space<vmem>>, vector<1x128xf32>
    %29 = vector.shape_cast %28 : vector<1x128xf32> to vector<128xf32>
    %30 = vector.shape_cast %29 : vector<128xf32> to vector<1x128xf32>
    %31 = vector.broadcast %30 : vector<1x128xf32> to vector<8x128xf32>
    %32 = arith.addf %27, %31 : vector<8x128xf32>
    %33 = math.tanh %32 : vector<8x128xf32>
    %cst_11 = arith.constant 5.000000e-01 : f32
    %34 = vector.broadcast %cst_11 : f32 to vector<8x128xf32>
    %35 = arith.mulf %34, %33 : vector<8x128xf32>
    %cst_12 = arith.constant 5.000000e-01 : f32
    %36 = vector.broadcast %cst_12 : f32 to vector<8x128xf32>
    %37 = arith.addf %35, %36 : vector<8x128xf32>
    %38 = arith.select %2, %33, %37 : vector<8x128xi1>, vector<8x128xf32>
    %c64_i32_13 = arith.constant 64 : i32
    %39 = tpu.dynamic_rotate %38 by %c64_i32_13 dim 1 : vector<8x128xf32>, i32 -> vector<8x128xf32>
    %40 = arith.mulf %38, %39 : vector<8x128xf32>
    %41 = math.tanh %40 : vector<8x128xf32>
    %c32_i32_14 = arith.constant 32 : i32
    %42 = tpu.dynamic_rotate %41 by %c32_i32_14 dim 1 : vector<8x128xf32>, i32 -> vector<8x128xf32>
    %43 = arith.mulf %38, %42 : vector<8x128xf32>
    %44 = vector.extract_strided_slice %43 {offsets = [0, 0], sizes = [8, 32], strides = [1, 1]} : vector<8x128xf32> to vector<8x32xf32>
    %c1_15 = arith.constant 1 : index
    %c0_16 = arith.constant 0 : index
    %c0_17 = arith.constant 0 : index
    %45 = vector.load %arg2[%c1_15, %c0_16, %c0_17] : memref<11x32x128xf32, #tpu.memory_space<vmem>>, vector<1x32x128xf32>
    %46 = vector.shape_cast %45 : vector<1x32x128xf32> to vector<32x128xf32>
    %cst_18 = arith.constant dense<0.000000e+00> : vector<8x128xf32>
    %47 = tpu.matmul %44, %46, %cst_18 {dimension_numbers = #tpu.dot_dimension_numbers<[1], [0], [0], [1], [0, 0, 1, 1], [], []>} : vector<8x32xf32>, vector<32x128xf32>, vector<8x128xf32> -> vector<8x128xf32>
    %c2 = arith.constant 2 : index
    %c0_19 = arith.constant 0 : index
    %48 = vector.load %arg3[%c2, %c0_19] : memref<12x128xf32, #tpu.memory_space<vmem>>, vector<1x128xf32>
    %49 = vector.shape_cast %48 : vector<1x128xf32> to vector<128xf32>
    %50 = vector.shape_cast %49 : vector<128xf32> to vector<1x128xf32>
    %51 = vector.broadcast %50 : vector<1x128xf32> to vector<8x128xf32>
    %52 = arith.addf %47, %51 : vector<8x128xf32>
    %53 = math.tanh %52 : vector<8x128xf32>
    %cst_20 = arith.constant 5.000000e-01 : f32
    %54 = vector.broadcast %cst_20 : f32 to vector<8x128xf32>
    %55 = arith.mulf %54, %53 : vector<8x128xf32>
    %cst_21 = arith.constant 5.000000e-01 : f32
    %56 = vector.broadcast %cst_21 : f32 to vector<8x128xf32>
    %57 = arith.addf %55, %56 : vector<8x128xf32>
    %58 = arith.select %2, %53, %57 : vector<8x128xi1>, vector<8x128xf32>
    %c64_i32_22 = arith.constant 64 : i32
    %59 = tpu.dynamic_rotate %58 by %c64_i32_22 dim 1 : vector<8x128xf32>, i32 -> vector<8x128xf32>
    %60 = arith.mulf %58, %59 : vector<8x128xf32>
    %61 = math.tanh %60 : vector<8x128xf32>
    %c32_i32_23 = arith.constant 32 : i32
    %62 = tpu.dynamic_rotate %61 by %c32_i32_23 dim 1 : vector<8x128xf32>, i32 -> vector<8x128xf32>
    %63 = arith.mulf %58, %62 : vector<8x128xf32>
    %64 = vector.extract_strided_slice %63 {offsets = [0, 0], sizes = [8, 32], strides = [1, 1]} : vector<8x128xf32> to vector<8x32xf32>
    %c2_24 = arith.constant 2 : index
    %c0_25 = arith.constant 0 : index
    %c0_26 = arith.constant 0 : index
    %65 = vector.load %arg2[%c2_24, %c0_25, %c0_26] : memref<11x32x128xf32, #tpu.memory_space<vmem>>, vector<1x32x128xf32>
    %66 = vector.shape_cast %65 : vector<1x32x128xf32> to vector<32x128xf32>
    %cst_27 = arith.constant dense<0.000000e+00> : vector<8x128xf32>
    %67 = tpu.matmul %64, %66, %cst_27 {dimension_numbers = #tpu.dot_dimension_numbers<[1], [0], [0], [1], [0, 0, 1, 1], [], []>} : vector<8x32xf32>, vector<32x128xf32>, vector<8x128xf32> -> vector<8x128xf32>
    %c3 = arith.constant 3 : index
    %c0_28 = arith.constant 0 : index
    %68 = vector.load %arg3[%c3, %c0_28] : memref<12x128xf32, #tpu.memory_space<vmem>>, vector<1x128xf32>
    %69 = vector.shape_cast %68 : vector<1x128xf32> to vector<128xf32>
    %70 = vector.shape_cast %69 : vector<128xf32> to vector<1x128xf32>
    %71 = vector.broadcast %70 : vector<1x128xf32> to vector<8x128xf32>
    %72 = arith.addf %67, %71 : vector<8x128xf32>
    %73 = math.tanh %72 : vector<8x128xf32>
    %cst_29 = arith.constant 5.000000e-01 : f32
    %74 = vector.broadcast %cst_29 : f32 to vector<8x128xf32>
    %75 = arith.mulf %74, %73 : vector<8x128xf32>
    %cst_30 = arith.constant 5.000000e-01 : f32
    %76 = vector.broadcast %cst_30 : f32 to vector<8x128xf32>
    %77 = arith.addf %75, %76 : vector<8x128xf32>
    %78 = arith.select %2, %73, %77 : vector<8x128xi1>, vector<8x128xf32>
    %c64_i32_31 = arith.constant 64 : i32
    %79 = tpu.dynamic_rotate %78 by %c64_i32_31 dim 1 : vector<8x128xf32>, i32 -> vector<8x128xf32>
    %80 = arith.mulf %78, %79 : vector<8x128xf32>
    %81 = math.tanh %80 : vector<8x128xf32>
    %c32_i32_32 = arith.constant 32 : i32
    %82 = tpu.dynamic_rotate %81 by %c32_i32_32 dim 1 : vector<8x128xf32>, i32 -> vector<8x128xf32>
    %83 = arith.mulf %78, %82 : vector<8x128xf32>
    %84 = vector.extract_strided_slice %83 {offsets = [0, 0], sizes = [8, 32], strides = [1, 1]} : vector<8x128xf32> to vector<8x32xf32>
    %c3_33 = arith.constant 3 : index
    %c0_34 = arith.constant 0 : index
    %c0_35 = arith.constant 0 : index
    %85 = vector.load %arg2[%c3_33, %c0_34, %c0_35] : memref<11x32x128xf32, #tpu.memory_space<vmem>>, vector<1x32x128xf32>
    %86 = vector.shape_cast %85 : vector<1x32x128xf32> to vector<32x128xf32>
    %cst_36 = arith.constant dense<0.000000e+00> : vector<8x128xf32>
    %87 = tpu.matmul %84, %86, %cst_36 {dimension_numbers = #tpu.dot_dimension_numbers<[1], [0], [0], [1], [0, 0, 1, 1], [], []>} : vector<8x32xf32>, vector<32x128xf32>, vector<8x128xf32> -> vector<8x128xf32>
    %c4 = arith.constant 4 : index
    %c0_37 = arith.constant 0 : index
    %88 = vector.load %arg3[%c4, %c0_37] : memref<12x128xf32, #tpu.memory_space<vmem>>, vector<1x128xf32>
    %89 = vector.shape_cast %88 : vector<1x128xf32> to vector<128xf32>
    %90 = vector.shape_cast %89 : vector<128xf32> to vector<1x128xf32>
    %91 = vector.broadcast %90 : vector<1x128xf32> to vector<8x128xf32>
    %92 = arith.addf %87, %91 : vector<8x128xf32>
    %93 = math.tanh %92 : vector<8x128xf32>
    %cst_38 = arith.constant 5.000000e-01 : f32
    %94 = vector.broadcast %cst_38 : f32 to vector<8x128xf32>
    %95 = arith.mulf %94, %93 : vector<8x128xf32>
    %cst_39 = arith.constant 5.000000e-01 : f32
    %96 = vector.broadcast %cst_39 : f32 to vector<8x128xf32>
    %97 = arith.addf %95, %96 : vector<8x128xf32>
    %98 = arith.select %2, %93, %97 : vector<8x128xi1>, vector<8x128xf32>
    %c64_i32_40 = arith.constant 64 : i32
    %99 = tpu.dynamic_rotate %98 by %c64_i32_40 dim 1 : vector<8x128xf32>, i32 -> vector<8x128xf32>
    %100 = arith.mulf %98, %99 : vector<8x128xf32>
    %101 = math.tanh %100 : vector<8x128xf32>
    %c32_i32_41 = arith.constant 32 : i32
    %102 = tpu.dynamic_rotate %101 by %c32_i32_41 dim 1 : vector<8x128xf32>, i32 -> vector<8x128xf32>
    %103 = arith.mulf %98, %102 : vector<8x128xf32>
    %104 = vector.extract_strided_slice %103 {offsets = [0, 0], sizes = [8, 32], strides = [1, 1]} : vector<8x128xf32> to vector<8x32xf32>
    %c4_42 = arith.constant 4 : index
    %c0_43 = arith.constant 0 : index
    %c0_44 = arith.constant 0 : index
    %105 = vector.load %arg2[%c4_42, %c0_43, %c0_44] : memref<11x32x128xf32, #tpu.memory_space<vmem>>, vector<1x32x128xf32>
    %106 = vector.shape_cast %105 : vector<1x32x128xf32> to vector<32x128xf32>
    %cst_45 = arith.constant dense<0.000000e+00> : vector<8x128xf32>
    %107 = tpu.matmul %104, %106, %cst_45 {dimension_numbers = #tpu.dot_dimension_numbers<[1], [0], [0], [1], [0, 0, 1, 1], [], []>} : vector<8x32xf32>, vector<32x128xf32>, vector<8x128xf32> -> vector<8x128xf32>
    %c5 = arith.constant 5 : index
    %c0_46 = arith.constant 0 : index
    %108 = vector.load %arg3[%c5, %c0_46] : memref<12x128xf32, #tpu.memory_space<vmem>>, vector<1x128xf32>
    %109 = vector.shape_cast %108 : vector<1x128xf32> to vector<128xf32>
    %110 = vector.shape_cast %109 : vector<128xf32> to vector<1x128xf32>
    %111 = vector.broadcast %110 : vector<1x128xf32> to vector<8x128xf32>
    %112 = arith.addf %107, %111 : vector<8x128xf32>
    %113 = math.tanh %112 : vector<8x128xf32>
    %cst_47 = arith.constant 5.000000e-01 : f32
    %114 = vector.broadcast %cst_47 : f32 to vector<8x128xf32>
    %115 = arith.mulf %114, %113 : vector<8x128xf32>
    %cst_48 = arith.constant 5.000000e-01 : f32
    %116 = vector.broadcast %cst_48 : f32 to vector<8x128xf32>
    %117 = arith.addf %115, %116 : vector<8x128xf32>
    %118 = arith.select %2, %113, %117 : vector<8x128xi1>, vector<8x128xf32>
    %c64_i32_49 = arith.constant 64 : i32
    %119 = tpu.dynamic_rotate %118 by %c64_i32_49 dim 1 : vector<8x128xf32>, i32 -> vector<8x128xf32>
    %120 = arith.mulf %118, %119 : vector<8x128xf32>
    %121 = math.tanh %120 : vector<8x128xf32>
    %c32_i32_50 = arith.constant 32 : i32
    %122 = tpu.dynamic_rotate %121 by %c32_i32_50 dim 1 : vector<8x128xf32>, i32 -> vector<8x128xf32>
    %123 = arith.mulf %118, %122 : vector<8x128xf32>
    %124 = vector.extract_strided_slice %123 {offsets = [0, 0], sizes = [8, 32], strides = [1, 1]} : vector<8x128xf32> to vector<8x32xf32>
    %c5_51 = arith.constant 5 : index
    %c0_52 = arith.constant 0 : index
    %c0_53 = arith.constant 0 : index
    %125 = vector.load %arg2[%c5_51, %c0_52, %c0_53] : memref<11x32x128xf32, #tpu.memory_space<vmem>>, vector<1x32x128xf32>
    %126 = vector.shape_cast %125 : vector<1x32x128xf32> to vector<32x128xf32>
    %cst_54 = arith.constant dense<0.000000e+00> : vector<8x128xf32>
    %127 = tpu.matmul %124, %126, %cst_54 {dimension_numbers = #tpu.dot_dimension_numbers<[1], [0], [0], [1], [0, 0, 1, 1], [], []>} : vector<8x32xf32>, vector<32x128xf32>, vector<8x128xf32> -> vector<8x128xf32>
    %c6 = arith.constant 6 : index
    %c0_55 = arith.constant 0 : index
    %128 = vector.load %arg3[%c6, %c0_55] : memref<12x128xf32, #tpu.memory_space<vmem>>, vector<1x128xf32>
    %129 = vector.shape_cast %128 : vector<1x128xf32> to vector<128xf32>
    %130 = vector.shape_cast %129 : vector<128xf32> to vector<1x128xf32>
    %131 = vector.broadcast %130 : vector<1x128xf32> to vector<8x128xf32>
    %132 = arith.addf %127, %131 : vector<8x128xf32>
    %133 = math.tanh %132 : vector<8x128xf32>
    %cst_56 = arith.constant 5.000000e-01 : f32
    %134 = vector.broadcast %cst_56 : f32 to vector<8x128xf32>
    %135 = arith.mulf %134, %133 : vector<8x128xf32>
    %cst_57 = arith.constant 5.000000e-01 : f32
    %136 = vector.broadcast %cst_57 : f32 to vector<8x128xf32>
    %137 = arith.addf %135, %136 : vector<8x128xf32>
    %138 = arith.select %2, %133, %137 : vector<8x128xi1>, vector<8x128xf32>
    %c64_i32_58 = arith.constant 64 : i32
    %139 = tpu.dynamic_rotate %138 by %c64_i32_58 dim 1 : vector<8x128xf32>, i32 -> vector<8x128xf32>
    %140 = arith.mulf %138, %139 : vector<8x128xf32>
    %141 = math.tanh %140 : vector<8x128xf32>
    %c32_i32_59 = arith.constant 32 : i32
    %142 = tpu.dynamic_rotate %141 by %c32_i32_59 dim 1 : vector<8x128xf32>, i32 -> vector<8x128xf32>
    %143 = arith.mulf %138, %142 : vector<8x128xf32>
    %144 = vector.extract_strided_slice %143 {offsets = [0, 0], sizes = [8, 32], strides = [1, 1]} : vector<8x128xf32> to vector<8x32xf32>
    %c6_60 = arith.constant 6 : index
    %c0_61 = arith.constant 0 : index
    %c0_62 = arith.constant 0 : index
    %145 = vector.load %arg2[%c6_60, %c0_61, %c0_62] : memref<11x32x128xf32, #tpu.memory_space<vmem>>, vector<1x32x128xf32>
    %146 = vector.shape_cast %145 : vector<1x32x128xf32> to vector<32x128xf32>
    %cst_63 = arith.constant dense<0.000000e+00> : vector<8x128xf32>
    %147 = tpu.matmul %144, %146, %cst_63 {dimension_numbers = #tpu.dot_dimension_numbers<[1], [0], [0], [1], [0, 0, 1, 1], [], []>} : vector<8x32xf32>, vector<32x128xf32>, vector<8x128xf32> -> vector<8x128xf32>
    %c7 = arith.constant 7 : index
    %c0_64 = arith.constant 0 : index
    %148 = vector.load %arg3[%c7, %c0_64] : memref<12x128xf32, #tpu.memory_space<vmem>>, vector<1x128xf32>
    %149 = vector.shape_cast %148 : vector<1x128xf32> to vector<128xf32>
    %150 = vector.shape_cast %149 : vector<128xf32> to vector<1x128xf32>
    %151 = vector.broadcast %150 : vector<1x128xf32> to vector<8x128xf32>
    %152 = arith.addf %147, %151 : vector<8x128xf32>
    %153 = math.tanh %152 : vector<8x128xf32>
    %cst_65 = arith.constant 5.000000e-01 : f32
    %154 = vector.broadcast %cst_65 : f32 to vector<8x128xf32>
    %155 = arith.mulf %154, %153 : vector<8x128xf32>
    %cst_66 = arith.constant 5.000000e-01 : f32
    %156 = vector.broadcast %cst_66 : f32 to vector<8x128xf32>
    %157 = arith.addf %155, %156 : vector<8x128xf32>
    %158 = arith.select %2, %153, %157 : vector<8x128xi1>, vector<8x128xf32>
    %c64_i32_67 = arith.constant 64 : i32
    %159 = tpu.dynamic_rotate %158 by %c64_i32_67 dim 1 : vector<8x128xf32>, i32 -> vector<8x128xf32>
    %160 = arith.mulf %158, %159 : vector<8x128xf32>
    %161 = math.tanh %160 : vector<8x128xf32>
    %c32_i32_68 = arith.constant 32 : i32
    %162 = tpu.dynamic_rotate %161 by %c32_i32_68 dim 1 : vector<8x128xf32>, i32 -> vector<8x128xf32>
    %163 = arith.mulf %158, %162 : vector<8x128xf32>
    %164 = vector.extract_strided_slice %163 {offsets = [0, 0], sizes = [8, 32], strides = [1, 1]} : vector<8x128xf32> to vector<8x32xf32>
    %c7_69 = arith.constant 7 : index
    %c0_70 = arith.constant 0 : index
    %c0_71 = arith.constant 0 : index
    %165 = vector.load %arg2[%c7_69, %c0_70, %c0_71] : memref<11x32x128xf32, #tpu.memory_space<vmem>>, vector<1x32x128xf32>
    %166 = vector.shape_cast %165 : vector<1x32x128xf32> to vector<32x128xf32>
    %cst_72 = arith.constant dense<0.000000e+00> : vector<8x128xf32>
    %167 = tpu.matmul %164, %166, %cst_72 {dimension_numbers = #tpu.dot_dimension_numbers<[1], [0], [0], [1], [0, 0, 1, 1], [], []>} : vector<8x32xf32>, vector<32x128xf32>, vector<8x128xf32> -> vector<8x128xf32>
    %c8 = arith.constant 8 : index
    %c0_73 = arith.constant 0 : index
    %168 = vector.load %arg3[%c8, %c0_73] : memref<12x128xf32, #tpu.memory_space<vmem>>, vector<1x128xf32>
    %169 = vector.shape_cast %168 : vector<1x128xf32> to vector<128xf32>
    %170 = vector.shape_cast %169 : vector<128xf32> to vector<1x128xf32>
    %171 = vector.broadcast %170 : vector<1x128xf32> to vector<8x128xf32>
    %172 = arith.addf %167, %171 : vector<8x128xf32>
    %173 = math.tanh %172 : vector<8x128xf32>
    %cst_74 = arith.constant 5.000000e-01 : f32
    %174 = vector.broadcast %cst_74 : f32 to vector<8x128xf32>
    %175 = arith.mulf %174, %173 : vector<8x128xf32>
    %cst_75 = arith.constant 5.000000e-01 : f32
    %176 = vector.broadcast %cst_75 : f32 to vector<8x128xf32>
    %177 = arith.addf %175, %176 : vector<8x128xf32>
    %178 = arith.select %2, %173, %177 : vector<8x128xi1>, vector<8x128xf32>
    %c64_i32_76 = arith.constant 64 : i32
    %179 = tpu.dynamic_rotate %178 by %c64_i32_76 dim 1 : vector<8x128xf32>, i32 -> vector<8x128xf32>
    %180 = arith.mulf %178, %179 : vector<8x128xf32>
    %181 = math.tanh %180 : vector<8x128xf32>
    %c32_i32_77 = arith.constant 32 : i32
    %182 = tpu.dynamic_rotate %181 by %c32_i32_77 dim 1 : vector<8x128xf32>, i32 -> vector<8x128xf32>
    %183 = arith.mulf %178, %182 : vector<8x128xf32>
    %184 = vector.extract_strided_slice %183 {offsets = [0, 0], sizes = [8, 32], strides = [1, 1]} : vector<8x128xf32> to vector<8x32xf32>
    %c8_78 = arith.constant 8 : index
    %c0_79 = arith.constant 0 : index
    %c0_80 = arith.constant 0 : index
    %185 = vector.load %arg2[%c8_78, %c0_79, %c0_80] : memref<11x32x128xf32, #tpu.memory_space<vmem>>, vector<1x32x128xf32>
    %186 = vector.shape_cast %185 : vector<1x32x128xf32> to vector<32x128xf32>
    %cst_81 = arith.constant dense<0.000000e+00> : vector<8x128xf32>
    %187 = tpu.matmul %184, %186, %cst_81 {dimension_numbers = #tpu.dot_dimension_numbers<[1], [0], [0], [1], [0, 0, 1, 1], [], []>} : vector<8x32xf32>, vector<32x128xf32>, vector<8x128xf32> -> vector<8x128xf32>
    %c9 = arith.constant 9 : index
    %c0_82 = arith.constant 0 : index
    %188 = vector.load %arg3[%c9, %c0_82] : memref<12x128xf32, #tpu.memory_space<vmem>>, vector<1x128xf32>
    %189 = vector.shape_cast %188 : vector<1x128xf32> to vector<128xf32>
    %190 = vector.shape_cast %189 : vector<128xf32> to vector<1x128xf32>
    %191 = vector.broadcast %190 : vector<1x128xf32> to vector<8x128xf32>
    %192 = arith.addf %187, %191 : vector<8x128xf32>
    %193 = math.tanh %192 : vector<8x128xf32>
    %cst_83 = arith.constant 5.000000e-01 : f32
    %194 = vector.broadcast %cst_83 : f32 to vector<8x128xf32>
    %195 = arith.mulf %194, %193 : vector<8x128xf32>
    %cst_84 = arith.constant 5.000000e-01 : f32
    %196 = vector.broadcast %cst_84 : f32 to vector<8x128xf32>
    %197 = arith.addf %195, %196 : vector<8x128xf32>
    %198 = arith.select %2, %193, %197 : vector<8x128xi1>, vector<8x128xf32>
    %c64_i32_85 = arith.constant 64 : i32
    %199 = tpu.dynamic_rotate %198 by %c64_i32_85 dim 1 : vector<8x128xf32>, i32 -> vector<8x128xf32>
    %200 = arith.mulf %198, %199 : vector<8x128xf32>
    %201 = math.tanh %200 : vector<8x128xf32>
    %c32_i32_86 = arith.constant 32 : i32
    %202 = tpu.dynamic_rotate %201 by %c32_i32_86 dim 1 : vector<8x128xf32>, i32 -> vector<8x128xf32>
    %203 = arith.mulf %198, %202 : vector<8x128xf32>
    %204 = vector.extract_strided_slice %203 {offsets = [0, 0], sizes = [8, 32], strides = [1, 1]} : vector<8x128xf32> to vector<8x32xf32>
    %c9_87 = arith.constant 9 : index
    %c0_88 = arith.constant 0 : index
    %c0_89 = arith.constant 0 : index
    %205 = vector.load %arg2[%c9_87, %c0_88, %c0_89] : memref<11x32x128xf32, #tpu.memory_space<vmem>>, vector<1x32x128xf32>
    %206 = vector.shape_cast %205 : vector<1x32x128xf32> to vector<32x128xf32>
    %cst_90 = arith.constant dense<0.000000e+00> : vector<8x128xf32>
    %207 = tpu.matmul %204, %206, %cst_90 {dimension_numbers = #tpu.dot_dimension_numbers<[1], [0], [0], [1], [0, 0, 1, 1], [], []>} : vector<8x32xf32>, vector<32x128xf32>, vector<8x128xf32> -> vector<8x128xf32>
    %c10 = arith.constant 10 : index
    %c0_91 = arith.constant 0 : index
    %208 = vector.load %arg3[%c10, %c0_91] : memref<12x128xf32, #tpu.memory_space<vmem>>, vector<1x128xf32>
    %209 = vector.shape_cast %208 : vector<1x128xf32> to vector<128xf32>
    %210 = vector.shape_cast %209 : vector<128xf32> to vector<1x128xf32>
    %211 = vector.broadcast %210 : vector<1x128xf32> to vector<8x128xf32>
    %212 = arith.addf %207, %211 : vector<8x128xf32>
    %213 = math.tanh %212 : vector<8x128xf32>
    %cst_92 = arith.constant 5.000000e-01 : f32
    %214 = vector.broadcast %cst_92 : f32 to vector<8x128xf32>
    %215 = arith.mulf %214, %213 : vector<8x128xf32>
    %cst_93 = arith.constant 5.000000e-01 : f32
    %216 = vector.broadcast %cst_93 : f32 to vector<8x128xf32>
    %217 = arith.addf %215, %216 : vector<8x128xf32>
    %218 = arith.select %2, %213, %217 : vector<8x128xi1>, vector<8x128xf32>
    %c64_i32_94 = arith.constant 64 : i32
    %219 = tpu.dynamic_rotate %218 by %c64_i32_94 dim 1 : vector<8x128xf32>, i32 -> vector<8x128xf32>
    %220 = arith.mulf %218, %219 : vector<8x128xf32>
    %221 = math.tanh %220 : vector<8x128xf32>
    %c32_i32_95 = arith.constant 32 : i32
    %222 = tpu.dynamic_rotate %221 by %c32_i32_95 dim 1 : vector<8x128xf32>, i32 -> vector<8x128xf32>
    %223 = arith.mulf %218, %222 : vector<8x128xf32>
    %224 = vector.extract_strided_slice %223 {offsets = [0, 0], sizes = [8, 32], strides = [1, 1]} : vector<8x128xf32> to vector<8x32xf32>
    %c10_96 = arith.constant 10 : index
    %c0_97 = arith.constant 0 : index
    %c0_98 = arith.constant 0 : index
    %225 = vector.load %arg2[%c10_96, %c0_97, %c0_98] : memref<11x32x128xf32, #tpu.memory_space<vmem>>, vector<1x32x128xf32>
    %226 = vector.shape_cast %225 : vector<1x32x128xf32> to vector<32x128xf32>
    %cst_99 = arith.constant dense<0.000000e+00> : vector<8x128xf32>
    %227 = tpu.matmul %224, %226, %cst_99 {dimension_numbers = #tpu.dot_dimension_numbers<[1], [0], [0], [1], [0, 0, 1, 1], [], []>} : vector<8x32xf32>, vector<32x128xf32>, vector<8x128xf32> -> vector<8x128xf32>
    %c11 = arith.constant 11 : index
    %c0_100 = arith.constant 0 : index
    %228 = vector.load %arg3[%c11, %c0_100] : memref<12x128xf32, #tpu.memory_space<vmem>>, vector<1x128xf32>
    %229 = vector.shape_cast %228 : vector<1x128xf32> to vector<128xf32>
    %230 = vector.shape_cast %229 : vector<128xf32> to vector<1x128xf32>
    %231 = vector.broadcast %230 : vector<1x128xf32> to vector<8x128xf32>
    %232 = arith.addf %227, %231 : vector<8x128xf32>
    %233 = math.tanh %232 : vector<8x128xf32>
    %cst_101 = arith.constant 5.000000e-01 : f32
    %234 = vector.broadcast %cst_101 : f32 to vector<8x128xf32>
    %235 = arith.mulf %234, %233 : vector<8x128xf32>
    %cst_102 = arith.constant 5.000000e-01 : f32
    %236 = vector.broadcast %cst_102 : f32 to vector<8x128xf32>
    %237 = arith.addf %235, %236 : vector<8x128xf32>
    %238 = arith.select %2, %233, %237 : vector<8x128xi1>, vector<8x128xf32>
    %c64_i32_103 = arith.constant 64 : i32
    %239 = tpu.dynamic_rotate %238 by %c64_i32_103 dim 1 : vector<8x128xf32>, i32 -> vector<8x128xf32>
    %240 = arith.mulf %238, %239 : vector<8x128xf32>
    %241 = math.tanh %240 : vector<8x128xf32>
    %c32_i32_104 = arith.constant 32 : i32
    %242 = tpu.dynamic_rotate %241 by %c32_i32_104 dim 1 : vector<8x128xf32>, i32 -> vector<8x128xf32>
    %243 = arith.mulf %238, %242 : vector<8x128xf32>
    %244 = vector.extract_strided_slice %243 {offsets = [0, 0], sizes = [8, 32], strides = [1, 1]} : vector<8x128xf32> to vector<8x32xf32>
    %c0_105 = arith.constant 0 : index
    %c0_106 = arith.constant 0 : index
    %245 = vector.load %arg4[%c0_105, %c0_106] : memref<32x1xf32, #tpu.memory_space<vmem>>, vector<32x1xf32>
    %cst_107 = arith.constant dense<0.000000e+00> : vector<8x1xf32>
    %246 = tpu.matmul %244, %245, %cst_107 {dimension_numbers = #tpu.dot_dimension_numbers<[1], [0], [0], [1], [0, 0, 1, 1], [], []>} : vector<8x32xf32>, vector<32x1xf32>, vector<8x1xf32> -> vector<8x1xf32>
    %c0_108 = arith.constant 0 : index
    %247 = memref.load %arg5[%c0_108] : memref<1xf32, #tpu.memory_space<smem>>
    %248 = vector.broadcast %247 : f32 to vector<8x1xf32>
    %249 = arith.addf %246, %248 : vector<8x1xf32>
    %c0_109 = arith.constant 0 : index
    %c0_110 = arith.constant 0 : index
    %250 = vector.load %arg6[%c0_109, %c0_110] : memref<8x1xf32, #tpu.memory_space<vmem>>, vector<8x1xf32>
    tpu.vector_store %arg6[%c0_109, %c0_110], %249 {strides = array<i32>} : memref<8x1xf32, #tpu.memory_space<vmem>>, vector<8x1xf32>,
    return
  }
}

</mosaic_0001>

<bundles_post_ra>
// kernel: tpu_custom_call.1
= control target key start
LH: loop header
LB: loop body
LE: loop exit
PB: predicated region body
PF: predicated region fallthrough
CT: control target
= control target key end

     0   :  { %12 = vsyncpa [#allocation4], 0  ;;  %s661_s24 = smov [#allocation3]   ;;  %s662_s26 = smov 128   ;;  %s828_s0 = inlined_call_operand.vmem [shape: f32[8,1], index: 0, kind: input, shape index: {}]   ;;  %s829_s1 = inlined_call_operand.vmem [shape: f32[1,128], index: 1, kind: input, shape index: {}]   ;;  %s830_s2 = inlined_call_operand.hbm [shape: f32[11,32,128], index: 2, kind: input, shape index: {}]   ;;  %s831_s3 = inlined_call_operand.vmem [shape: f32[12,128], index: 3, kind: input, shape index: {}]   ;;  %s832_s4 = inlined_call_operand.vmem [shape: f32[32,1], index: 4, kind: input, shape index: {}]   ;;  %s833_s5 = inlined_call_operand.<no memory space> [shape: f32[1], index: 5, kind: input, shape index: {}]   ;;  %s834_s6 = inlined_call_operand.vmem [shape: f32[8,1], index: 6, kind: output, shape index: {}]  }
   0x1   :  { %s21_s23 = sshll.u32 %s830_s2, 4  ;;  %s23_s25 = sshll.u32 %s661_s24, 4  ;;  %s22_s23 = int_to_ptr.hbm [resolvable:$true] %s21_s23  ;;  %s24_s25 = int_to_ptr.vmem [resolvable:$true] %s23_s25 }
   0x2   :  { %s663_s27 = smov 8  }
   0x3   :  { %29 = dma.hbm_to_vmem [thread:$0]  %s22_s23, 5632, %s24_s25, [#allocation4], %s662_s26, %s662_s26, %s663_s27  }
   0x4   :  { %659 = dma.done.wait [#allocation4], 5632  }
   0x5   :  { %660 = vsyncadd [#allocation4], 4294961664  ;;  %v664_v0 = vmov 0   ;;  %v43_v1 = vld [vmem:[%s828_s0] sm:$0xff]  ;;  %v40_v7 = vlaneseq  ;;  %s665_s0 = smov 64   ;;  %v71_v13 = vld [vmem:[#allocation3 + $0x18] sm:$0xff] }
   0x6   :  { %573 = vset.pattern.permute.xlu0 %v664_v0  ;;  %v574_v2 = vld [vmem:[%s829_s1] ss:$0 sm:$0xff]  ;;  %v70_v14 = vld [vmem:[#allocation3 + $0x10] sm:$0xff]  ;;  %90 = vmatpush.msra.mxu0 %v71_v13  ;;  %v69_v15 = vld [vmem:[#allocation3 + $0x8] sm:$0xff]  ;;  %s666_s1 = smov 32   ;;  %vm74_vm1 = vcmask 261120  }
   0x7   :  { %47 = vperm.xlu0 %573, %v43_v1   ;;  %v575_v3 = vld [vmem:[%s831_s3] ss:$0 sm:$0xff]  ;;  %v714_v8 = vand.u32 127, %v40_v7  ;;  %v576_v22 = vld [vmem:[%s831_s3 + $0x1] ss:$0 sm:$0xff]  ;;  %v113_v29 = vld [vmem:[#allocation3 + $0x38] sm:$0xff] }
   0x8   :  { %91 = vmatpush.msra.mxu0 %v70_v14  ;;  %v68_v19 = vld [vmem:[#allocation3] sm:$0xff]  ;;  %v112_v30 = vld [vmem:[#allocation3 + $0x30] sm:$0xff]  ;;  %131 = vmatpush.msra.mxu1 %v113_v29  ;;  %v111_v31 = vld [vmem:[#allocation3 + $0x28] sm:$0xff]  ;;  %vm548_vm2 = vcmask 7168  }
   0x9   :  { %vm42_vm0 = vcmp.ge.s32.totalorder %v714_v8, 96  ;;  %v110_v35 = vld [vmem:[#allocation3 + $0x20] sm:$0xff]  ;;  %v154_v45 = vld [vmem:[#allocation3 + $0x58] sm:$0xff]  ;;  %v153_v46 = vld [vmem:[#allocation3 + $0x50] sm:$0xff] }
   0xa   :  { %92 = vmatpush.msra.mxu0 %v69_v15  ;;  %132 = vmatpush.msra.mxu1 %v112_v30  ;;  %v577_v38 = vld [vmem:[%s831_s3 + $0x2] ss:$0 sm:$0xff]  ;;  %v152_v47 = vld [vmem:[#allocation3 + $0x48] sm:$0xff]  ;;  %v578_v54 = vld [vmem:[%s831_s3 + $0x3] ss:$0 sm:$0xff] }
   0xb   :  { %172 = vmatpush.msra.mxu2 %v154_v45  ;;  %v151_v51 = vld [vmem:[#allocation3 + $0x40] sm:$0xff]  ;;  %v195_v61 = vld [vmem:[#allocation3 + $0x78] sm:$0xff]  ;;  %v194_v62 = vld [vmem:[#allocation3 + $0x70] sm:$0xff] }
   0xc   :  { %93 = vmatpush.msra.mxu0 %v68_v19  ;;  %133 = vmatpush.msra.mxu1 %v111_v31  ;;  %v193_v63 = vld [vmem:[#allocation3 + $0x68] sm:$0xff]  ;;  %v236_v14 = vld [vmem:[#allocation3 + $0x98] sm:$0xff]  ;;  %v235_v15 = vld [vmem:[#allocation3 + $0x90] sm:$0xff] }
   0xd   :  { %173 = vmatpush.msra.mxu2 %v153_v46  ;;  %213 = vmatpush.msra.mxu3 %v195_v61  ;;  %v277_v30 = vld [vmem:[#allocation3 + $0xb8] sm:$0xff]  ;;  %v276_v31 = vld [vmem:[#allocation3 + $0xb0] sm:$0xff] }
   0xe   :  { %134 = vmatpush.msra.mxu1 %v110_v35  ;;  %254 = vmatpush.msrb.mxu0 %v236_v14  ;;  %v318_v46 = vld [vmem:[#allocation3 + $0xd8] sm:$0xff] }
   0xf   :  { %174 = vmatpush.msra.mxu2 %v152_v47  ;;  %214 = vmatpush.msra.mxu3 %v194_v62  ;;  %v317_v47 = vld [vmem:[#allocation3 + $0xd0] sm:$0xff]  ;;  %v359_v62 = vld [vmem:[#allocation3 + $0xf8] sm:$0xff] }
  0x10   :  { %255 = vmatpush.msrb.mxu0 %v235_v15  ;;  %295 = vmatpush.msrb.mxu1 %v277_v30  ;;  %v400_v15 = vld [vmem:[#allocation3 + $0x118] sm:$0xff] }
  0x11   :  { %175 = vmatpush.msra.mxu2 %v151_v51  ;;  %215 = vmatpush.msra.mxu3 %v193_v63  ;;  %v358_v63 = vld [vmem:[#allocation3 + $0xf0] sm:$0xff] }
  0x12   :  { %296 = vmatpush.msrb.mxu1 %v276_v31  ;;  %v441_v31 = vld [vmem:[#allocation3 + $0x138] sm:$0xff] }
  0x13   :  { %336 = vmatpush.msrb.mxu2 %v318_v46 }
  0x15   :  { %337 = vmatpush.msrb.mxu2 %v317_v47  ;;  %v482_v47 = vld [vmem:[#allocation3 + $0x158] sm:$0xff] }
  0x79   :  { %v48_v4 = vpop.permute.xlu0 %47 }
  0x7a   :  { %v53_v5 = vmul.f32 %v574_v2, %v48_v4 }
  0x7c   :  { %v56_v6 = vadd.f32 %v575_v3, %v53_v5  ;;  %v192_v3 = vld [vmem:[#allocation3 + $0x60] sm:$0xff] }
  0x7d   :  { %216 = vmatpush.msra.mxu3 %v192_v3 }
  0x7e   :  { %587 = vtanh.f32 %v56_v6  ;;  %v579_v6 = vld [vmem:[%s831_s3 + $0x4] ss:$0 sm:$0xff] }
  0x7f   :  { %377 = vmatpush.msrb.mxu3 %v359_v62 }
  0x81   :  { %378 = vmatpush.msrb.mxu3 %v358_v63  ;;  %v522_v63 = vld [vmem:[%s832_s4 + $0x18] sm:$0xff] }
  0x84   :  { %v588_v9 = vpop.eup %587 }
  0x85   :  { %v58_v10 = vmul.f32 0.5, %v588_v9 }
  0x87   :  { %v59_v11 = vadd.f32 0.5, %v58_v10 }
  0x89   :  { %v60_v12 = vsel %vm42_vm0, %v588_v9, %v59_v11 }
  0x8a   :  { %61 = vrot.lane.b32.xlu0 %v60_v12, %s665_s0 }
  0xfc   :  { %v62_v16 = vpop.permute.xlu0 %61 }
  0xfd   :  { %v63_v17 = vmul.f32 %v62_v16, %v60_v12  ;;  %v234_v16 = vld [vmem:[#allocation3 + $0x88] sm:$0xff] }
  0xfe   :  { %256 = vmatpush.msrb.mxu0 %v234_v16  ;;  %v399_v16 = vld [vmem:[#allocation3 + $0x110] sm:$0xff] }
  0xff   :  { %589 = vtanh.f32 %v63_v17 }
 0x105   :  { %v590_v18 = vpop.eup %589 }
 0x106   :  { %65 = vrot.lane.b32.xlu1 %v590_v18, %s666_s1 }
 0x178   :  { %v66_v20 = vpop.permute.xlu1 %65 }
 0x179   :  { %v67_v21 = vmul.f32 %v66_v20, %v60_v12  ;;  %v233_v20 = vld [vmem:[#allocation3 + $0x80] sm:$0xff] }
 0x17a   :  { %257 = vmatpush.msrb.mxu0 %v233_v20 }
 0x17b   :  { %555 = vmatmul.msk.f32.vlgmr.msra.gmra.mxu0 %vm74_vm1, %v67_v21 }
 0x17c   :  { %418 = vmatpush.msra.mxu0 %v400_v15 }
 0x17e   :  { %419 = vmatpush.msra.mxu0 %v399_v16 }
 0x1f8   :  { %v95_v23 = vpop.f32.mrf.mxu0 }
 0x1f9   :  { %v96_v24 = vadd.f32 %v576_v22, %v95_v23  ;;  %v580_v23 = vld [vmem:[%s831_s3 + $0x5] ss:$0 sm:$0xff] }
 0x1fb   :  { %591 = vtanh.f32 %v96_v24 }
 0x201   :  { %v592_v25 = vpop.eup %591 }
 0x202   :  { %v99_v26 = vmul.f32 0.5, %v592_v25 }
 0x204   :  { %v100_v27 = vadd.f32 0.5, %v99_v26 }
 0x206   :  { %v101_v28 = vsel %vm42_vm0, %v592_v25, %v100_v27 }
 0x207   :  { %102 = vrot.lane.b32.xlu1 %v101_v28, %s665_s0 }
 0x279   :  { %v103_v32 = vpop.permute.xlu1 %102 }
 0x27a   :  { %v104_v33 = vmul.f32 %v103_v32, %v101_v28  ;;  %v275_v32 = vld [vmem:[#allocation3 + $0xa8] sm:$0xff] }
 0x27b   :  { %297 = vmatpush.msrb.mxu1 %v275_v32  ;;  %v440_v32 = vld [vmem:[#allocation3 + $0x130] sm:$0xff] }
 0x27c   :  { %593 = vtanh.f32 %v104_v33 }
 0x282   :  { %v594_v34 = vpop.eup %593 }
 0x283   :  { %106 = vrot.lane.b32.xlu2 %v594_v34, %s666_s1 }
 0x2dd   :  { %v107_v36 = vpop.permute.xlu2 %106 }
 0x2de   :  { %v108_v37 = vmul.f32 %v107_v36, %v101_v28  ;;  %v274_v36 = vld [vmem:[#allocation3 + $0xa0] sm:$0xff] }
 0x2df   :  { %298 = vmatpush.msrb.mxu1 %v274_v36 }
 0x2e0   :  { %556 = vmatmul.msk.f32.vlgmr.msra.gmra.mxu1 %vm74_vm1, %v108_v37 }
 0x2e1   :  { %459 = vmatpush.msra.mxu1 %v441_v31 }
 0x2e3   :  { %460 = vmatpush.msra.mxu1 %v440_v32 }
 0x35d   :  { %v136_v39 = vpop.f32.mrf.mxu1 }
 0x35e   :  { %v137_v40 = vadd.f32 %v577_v38, %v136_v39  ;;  %v581_v39 = vld [vmem:[%s831_s3 + $0x6] ss:$0 sm:$0xff] }
 0x360   :  { %595 = vtanh.f32 %v137_v40 }
 0x366   :  { %v596_v41 = vpop.eup %595 }
 0x367   :  { %v140_v42 = vmul.f32 0.5, %v596_v41 }
 0x369   :  { %v141_v43 = vadd.f32 0.5, %v140_v42 }
 0x36b   :  { %v142_v44 = vsel %vm42_vm0, %v596_v41, %v141_v43 }
 0x36c   :  { %143 = vrot.lane.b32.xlu2 %v142_v44, %s665_s0 }
 0x3c6   :  { %v144_v48 = vpop.permute.xlu2 %143 }
 0x3c7   :  { %v145_v49 = vmul.f32 %v144_v48, %v142_v44  ;;  %v316_v48 = vld [vmem:[#allocation3 + $0xc8] sm:$0xff] }
 0x3c8   :  { %338 = vmatpush.msrb.mxu2 %v316_v48  ;;  %v481_v48 = vld [vmem:[#allocation3 + $0x150] sm:$0xff] }
 0x3c9   :  { %597 = vtanh.f32 %v145_v49 }
 0x3cf   :  { %v598_v50 = vpop.eup %597 }
 0x3d0   :  { %147 = vrot.lane.b32.xlu0 %v598_v50, %s666_s1 }
 0x442   :  { %v148_v52 = vpop.permute.xlu0 %147 }
 0x443   :  { %v149_v53 = vmul.f32 %v148_v52, %v142_v44  ;;  %v315_v52 = vld [vmem:[#allocation3 + $0xc0] sm:$0xff] }
 0x444   :  { %339 = vmatpush.msrb.mxu2 %v315_v52 }
 0x445   :  { %557 = vmatmul.msk.f32.vlgmr.msra.gmra.mxu2 %vm74_vm1, %v149_v53 }
 0x446   :  { %500 = vmatpush.msra.mxu2 %v482_v47 }
 0x448   :  { %501 = vmatpush.msra.mxu2 %v481_v48 }
 0x4c8   :  { %v177_v55 = vpop.f32.mrf.mxu2 }
 0x4c9   :  { %v178_v56 = vadd.f32 %v578_v54, %v177_v55  ;;  %v582_v55 = vld [vmem:[%s831_s3 + $0x7] ss:$0 sm:$0xff] }
 0x4cb   :  { %599 = vtanh.f32 %v178_v56 }
 0x4d1   :  { %v600_v57 = vpop.eup %599 }
 0x4d2   :  { %v181_v58 = vmul.f32 0.5, %v600_v57 }
 0x4d4   :  { %v182_v59 = vadd.f32 0.5, %v181_v58 }
 0x4d6   :  { %v183_v60 = vsel %vm42_vm0, %v600_v57, %v182_v59 }
 0x4d7   :  { %184 = vrot.lane.b32.xlu1 %v183_v60, %s665_s0 }
 0x549   :  { %v185_v0 = vpop.permute.xlu1 %184 }
 0x54a   :  { %v186_v1 = vmul.f32 %v185_v0, %v183_v60  ;;  %v357_v0 = vld [vmem:[#allocation3 + $0xe8] sm:$0xff] }
 0x54b   :  { %379 = vmatpush.msrb.mxu3 %v357_v0  ;;  %v521_v0 = vld [vmem:[%s832_s4 + $0x10] sm:$0xff] }
 0x54c   :  { %601 = vtanh.f32 %v186_v1 }
 0x552   :  { %v602_v2 = vpop.eup %601 }
 0x553   :  { %188 = vrot.lane.b32.xlu2 %v602_v2, %s666_s1 }
 0x5ad   :  { %v189_v4 = vpop.permute.xlu2 %188 }
 0x5ae   :  { %v190_v5 = vmul.f32 %v189_v4, %v183_v60  ;;  %v356_v4 = vld [vmem:[#allocation3 + $0xe0] sm:$0xff] }
 0x5af   :  { %380 = vmatpush.msrb.mxu3 %v356_v4  ;;  %v519_v4 = vld [vmem:[%s832_s4] sm:$0xff] }
 0x5b0   :  { %558 = vmatmul.msk.f32.vlgmr.msra.gmra.mxu3 %vm74_vm1, %v190_v5 }
 0x5b1   :  { %540 = vmatpush.msra.mxu3 %v522_v63 }
 0x5b3   :  { %541 = vmatpush.msra.mxu3 %v521_v0 }
 0x633   :  { %v218_v7 = vpop.f32.mrf.mxu3 }
 0x634   :  { %v219_v9 = vadd.f32 %v579_v6, %v218_v7  ;;  %v583_v7 = vld [vmem:[%s831_s3 + $0x8] ss:$0 sm:$0xff] }
 0x636   :  { %603 = vtanh.f32 %v219_v9 }
 0x63c   :  { %v604_v10 = vpop.eup %603 }
 0x63d   :  { %v222_v11 = vmul.f32 0.5, %v604_v10 }
 0x63f   :  { %v223_v12 = vadd.f32 0.5, %v222_v11 }
 0x641   :  { %v224_v13 = vsel %vm42_vm0, %v604_v10, %v223_v12 }
 0x642   :  { %225 = vrot.lane.b32.xlu0 %v224_v13, %s665_s0 }
 0x6b4   :  { %v226_v17 = vpop.permute.xlu0 %225 }
 0x6b5   :  { %v227_v18 = vmul.f32 %v226_v17, %v224_v13  ;;  %v398_v17 = vld [vmem:[#allocation3 + $0x108] sm:$0xff] }
 0x6b6   :  { %420 = vmatpush.msra.mxu0 %v398_v17 }
 0x6b7   :  { %605 = vtanh.f32 %v227_v18 }
 0x6bd   :  { %v606_v19 = vpop.eup %605 }
 0x6be   :  { %229 = vrot.lane.b32.xlu1 %v606_v19, %s666_s1 }
 0x730   :  { %v230_v21 = vpop.permute.xlu1 %229 }
 0x731   :  { %v231_v22 = vmul.f32 %v230_v21, %v224_v13  ;;  %v397_v21 = vld [vmem:[#allocation3 + $0x100] sm:$0xff] }
 0x732   :  { %421 = vmatpush.msra.mxu0 %v397_v21 }
 0x733   :  { %559 = vmatmul.msk.f32.vlgmr.msrb.gmra.mxu0 %vm74_vm1, %v231_v22 }
 0x7b0   :  { %v259_v24 = vpop.f32.mrf.mxu0 }
 0x7b1   :  { %v260_v25 = vadd.f32 %v580_v23, %v259_v24  ;;  %v584_v24 = vld [vmem:[%s831_s3 + $0x9] ss:$0 sm:$0xff] }
 0x7b3   :  { %607 = vtanh.f32 %v260_v25 }
 0x7b9   :  { %v608_v26 = vpop.eup %607 }
 0x7ba   :  { %v263_v27 = vmul.f32 0.5, %v608_v26 }
 0x7bc   :  { %v264_v28 = vadd.f32 0.5, %v263_v27 }
 0x7be   :  { %v265_v29 = vsel %vm42_vm0, %v608_v26, %v264_v28 }
 0x7bf   :  { %266 = vrot.lane.b32.xlu2 %v265_v29, %s665_s0 }
 0x819   :  { %v267_v33 = vpop.permute.xlu2 %266 }
 0x81a   :  { %v268_v34 = vmul.f32 %v267_v33, %v265_v29  ;;  %v439_v33 = vld [vmem:[#allocation3 + $0x128] sm:$0xff] }
 0x81b   :  { %461 = vmatpush.msra.mxu1 %v439_v33 }
 0x81c   :  { %609 = vtanh.f32 %v268_v34 }
 0x822   :  { %v610_v35 = vpop.eup %609 }
 0x823   :  { %270 = vrot.lane.b32.xlu0 %v610_v35, %s666_s1 }
 0x895   :  { %v271_v37 = vpop.permute.xlu0 %270 }
 0x896   :  { %v272_v38 = vmul.f32 %v271_v37, %v265_v29  ;;  %v438_v37 = vld [vmem:[#allocation3 + $0x120] sm:$0xff] }
 0x897   :  { %462 = vmatpush.msra.mxu1 %v438_v37 }
 0x898   :  { %560 = vmatmul.msk.f32.vlgmr.msrb.gmra.mxu1 %vm74_vm1, %v272_v38 }
 0x915   :  { %v300_v40 = vpop.f32.mrf.mxu1 }
 0x916   :  { %v301_v41 = vadd.f32 %v581_v39, %v300_v40  ;;  %v585_v40 = vld [vmem:[%s831_s3 + $0xa] ss:$0 sm:$0xff] }
 0x918   :  { %611 = vtanh.f32 %v301_v41 }
 0x91e   :  { %v612_v42 = vpop.eup %611 }
 0x91f   :  { %v304_v43 = vmul.f32 0.5, %v612_v42 }
 0x921   :  { %v305_v44 = vadd.f32 0.5, %v304_v43 }
 0x923   :  { %v306_v45 = vsel %vm42_vm0, %v612_v42, %v305_v44 }
 0x924   :  { %307 = vrot.lane.b32.xlu1 %v306_v45, %s665_s0 }
 0x996   :  { %v308_v49 = vpop.permute.xlu1 %307 }
 0x997   :  { %v309_v50 = vmul.f32 %v308_v49, %v306_v45  ;;  %v480_v49 = vld [vmem:[#allocation3 + $0x148] sm:$0xff] }
 0x998   :  { %502 = vmatpush.msra.mxu2 %v480_v49 }
 0x999   :  { %613 = vtanh.f32 %v309_v50 }
 0x99f   :  { %v614_v51 = vpop.eup %613 }
 0x9a0   :  { %311 = vrot.lane.b32.xlu2 %v614_v51, %s666_s1 }
 0x9fa   :  { %v312_v53 = vpop.permute.xlu2 %311 }
 0x9fb   :  { %v313_v54 = vmul.f32 %v312_v53, %v306_v45  ;;  %v479_v53 = vld [vmem:[#allocation3 + $0x140] sm:$0xff] }
 0x9fc   :  { %503 = vmatpush.msra.mxu2 %v479_v53 }
 0x9fd   :  { %561 = vmatmul.msk.f32.vlgmr.msrb.gmra.mxu2 %vm74_vm1, %v313_v54 }
 0xa80   :  { %v341_v56 = vpop.f32.mrf.mxu2 }
 0xa81   :  { %v342_v57 = vadd.f32 %v582_v55, %v341_v56  ;;  %v586_v56 = vld [vmem:[%s831_s3 + $0xb] ss:$0 sm:$0xff] }
 0xa83   :  { %615 = vtanh.f32 %v342_v57 }
 0xa89   :  { %v616_v58 = vpop.eup %615 }
 0xa8a   :  { %v345_v59 = vmul.f32 0.5, %v616_v58 }
 0xa8c   :  { %v346_v60 = vadd.f32 0.5, %v345_v59 }
 0xa8e   :  { %v347_v61 = vsel %vm42_vm0, %v616_v58, %v346_v60 }
 0xa8f   :  { %348 = vrot.lane.b32.xlu0 %v347_v61, %s665_s0 }
 0xb01   :  { %v349_v1 = vpop.permute.xlu0 %348 }
 0xb02   :  { %v350_v2 = vmul.f32 %v349_v1, %v347_v61  ;;  %v520_v1 = vld [vmem:[%s832_s4 + $0x8] sm:$0xff] }
 0xb03   :  { %542 = vmatpush.msra.mxu3 %v520_v1 }
 0xb04   :  { %617 = vtanh.f32 %v350_v2 }
 0xb05   :  { %543 = vmatpush.msra.mxu3 %v519_v4 }
 0xb0a   :  { %v618_v3 = vpop.eup %617 }
 0xb0b   :  { %352 = vrot.lane.b32.xlu1 %v618_v3, %s666_s1 }
 0xb7d   :  { %v353_v5 = vpop.permute.xlu1 %352 }
 0xb7e   :  { %v354_v6 = vmul.f32 %v353_v5, %v347_v61 }
 0xb80   :  { %562 = vmatmul.msk.f32.vlgmr.msrb.gmra.mxu3 %vm74_vm1, %v354_v6 }
 0xc03   :  { %v382_v9 = vpop.f32.mrf.mxu3 }
 0xc04   :  { %v383_v10 = vadd.f32 %v583_v7, %v382_v9  ;;  %v524_v7 = vstv %s833_s5 }
 0xc06   :  { %619 = vtanh.f32 %v383_v10 }
 0xc0c   :  { %v620_v11 = vpop.eup %619 }
 0xc0d   :  { %v386_v12 = vmul.f32 0.5, %v620_v11 }
 0xc0f   :  { %v387_v13 = vadd.f32 0.5, %v386_v12 }
 0xc11   :  { %v388_v14 = vsel %vm42_vm0, %v620_v11, %v387_v13 }
 0xc12   :  { %389 = vrot.lane.b32.xlu2 %v388_v14, %s665_s0 }
 0xc6c   :  { %v390_v18 = vpop.permute.xlu2 %389 }
 0xc6d   :  { %v391_v19 = vmul.f32 %v390_v18, %v388_v14 }
 0xc6f   :  { %621 = vtanh.f32 %v391_v19 }
 0xc75   :  { %v622_v20 = vpop.eup %621 }
 0xc76   :  { %393 = vrot.lane.b32.xlu0 %v622_v20, %s666_s1 }
 0xce8   :  { %v394_v22 = vpop.permute.xlu0 %393 }
 0xce9   :  { %v395_v23 = vmul.f32 %v394_v22, %v388_v14 }
 0xceb   :  { %563 = vmatmul.msk.f32.vlgmr.msra.gmra.mxu0 %vm74_vm1, %v395_v23 }
 0xd68   :  { %v423_v25 = vpop.f32.mrf.mxu0 }
 0xd69   :  { %v424_v26 = vadd.f32 %v584_v24, %v423_v25 }
 0xd6b   :  { %623 = vtanh.f32 %v424_v26 }
 0xd71   :  { %v624_v27 = vpop.eup %623 }
 0xd72   :  { %v427_v28 = vmul.f32 0.5, %v624_v27 }
 0xd74   :  { %v428_v29 = vadd.f32 0.5, %v427_v28 }
 0xd76   :  { %v429_v30 = vsel %vm42_vm0, %v624_v27, %v428_v29 }
 0xd77   :  { %430 = vrot.lane.b32.xlu1 %v429_v30, %s665_s0 }
 0xde9   :  { %v431_v34 = vpop.permute.xlu1 %430 }
 0xdea   :  { %v432_v35 = vmul.f32 %v431_v34, %v429_v30 }
 0xdec   :  { %625 = vtanh.f32 %v432_v35 }
 0xdf2   :  { %v626_v36 = vpop.eup %625 }
 0xdf3   :  { %434 = vrot.lane.b32.xlu2 %v626_v36, %s666_s1 }
 0xe4d   :  { %v435_v38 = vpop.permute.xlu2 %434 }
 0xe4e   :  { %v436_v39 = vmul.f32 %v435_v38, %v429_v30 }
 0xe50   :  { %564 = vmatmul.msk.f32.vlgmr.msra.gmra.mxu1 %vm74_vm1, %v436_v39 }
 0xecd   :  { %v464_v41 = vpop.f32.mrf.mxu1 }
 0xece   :  { %v465_v42 = vadd.f32 %v585_v40, %v464_v41 }
 0xed0   :  { %627 = vtanh.f32 %v465_v42 }
 0xed6   :  { %v628_v43 = vpop.eup %627 }
 0xed7   :  { %v468_v44 = vmul.f32 0.5, %v628_v43 }
 0xed9   :  { %v469_v45 = vadd.f32 0.5, %v468_v44 }
 0xedb   :  { %v470_v46 = vsel %vm42_vm0, %v628_v43, %v469_v45 }
 0xedc   :  { %471 = vrot.lane.b32.xlu0 %v470_v46, %s665_s0 }
 0xf4e   :  { %v472_v50 = vpop.permute.xlu0 %471 }
 0xf4f   :  { %v473_v51 = vmul.f32 %v472_v50, %v470_v46 }
 0xf51   :  { %629 = vtanh.f32 %v473_v51 }
 0xf57   :  { %v630_v52 = vpop.eup %629 }
 0xf58   :  { %475 = vrot.lane.b32.xlu1 %v630_v52, %s666_s1 }
 0xfca   :  { %v476_v54 = vpop.permute.xlu1 %475 }
 0xfcb   :  { %v477_v55 = vmul.f32 %v476_v54, %v470_v46 }
 0xfcd   :  { %565 = vmatmul.msk.f32.vlgmr.msra.gmra.mxu2 %vm74_vm1, %v477_v55 }
0x1050   :  { %v505_v57 = vpop.f32.mrf.mxu2 }
0x1051   :  { %v506_v58 = vadd.f32 %v586_v56, %v505_v57 }
0x1053   :  { %631 = vtanh.f32 %v506_v58 }
0x1059   :  { %v632_v59 = vpop.eup %631 }
0x105a   :  { %v509_v60 = vmul.f32 0.5, %v632_v59 }
0x105c   :  { %v510_v61 = vadd.f32 0.5, %v509_v60 }
0x105e   :  { %v511_v62 = vsel %vm42_vm0, %v632_v59, %v510_v61 }
0x105f   :  { %512 = vrot.lane.b32.xlu2 %v511_v62, %s665_s0 }
0x10b9   :  { %v513_v2 = vpop.permute.xlu2 %512 }
0x10ba   :  { %v514_v8 = vmul.f32 %v513_v2, %v511_v62 }
0x10bc   :  { %633 = vtanh.f32 %v514_v8 }
0x10c2   :  { %v634_v3 = vpop.eup %633 }
0x10c3   :  { %516 = vrot.lane.b32.xlu0 %v634_v3, %s666_s1 }
0x1135   :  { %v517_v5 = vpop.permute.xlu0 %516 }
0x1136   :  { %v518_v6 = vmul.f32 %v517_v5, %v511_v62 }
0x1138   :  { %566 = vmatmul.msk.f32.vlgmr.msra.gmra.mxu3 %vm74_vm1, %v518_v6 }
0x11bb   :  { %v545_v9 = vpop.f32.mrf.mxu3 }
0x11bc   :  { %v546_v10 = vadd.f32 %v545_v9, %v524_v7 }
0x11be   :  { %549 = vst.msk [vmem:[%s834_s6] sm:$0xff] %vm548_vm2, %v546_v10 }
0x11bf   :  { %554 = vsyncpa [#allocation4], 1 }

</bundles_post_ra>
